<compile_context>
chip_gen: v5e
topology: v5e:2x2
jax: 0.10.0
libtpu: 0.0.40
codegen_flags: <defaults>
</compile_context>

<pallas_src>
import functools

import jax
import jax.numpy as jnp
import numpy as np
from jax.experimental import pallas as pl
from jax.experimental.pallas import tpu as pltpu

F_PAD = 128      # lane-dense feature width inside the kernels
ONES_LANE = 125  # seq lane holding constant 1.0 -> coef row-sum falls out of the matmul
C_F1 = 126       # staging lane carrying f1 (= seq_fts @ w_f1^T + b_f1) out of kernel 1
C_F2 = 127       # staging lane carrying f2


def _round_up(v, m):
    return (v + m - 1) // m * m


# ------------------- kernel 1: per-node feature chain --------------------- #

def _feat_kernel(x_ref, w_ref, seq_ref, f1_ref, f2_ref):
    # x:   [TM, F_in+1]   (last column is constant 1 -> biases / ones-lane via matmul)
    # w:   [F_in+1, F_PAD] fused  W_lin^T @ W_seq^T  (+ f1/f2 columns + ones column)
    y = jnp.dot(x_ref[...], w_ref[...], preferred_element_type=jnp.float32)  # [TM, F_PAD]
    f1_ref[...] = y[:, C_F1:C_F1 + 1]          # bias already folded in via ones column
    f2_ref[...] = y[:, C_F2:C_F2 + 1]
    # bf16 seq_fts for kernel 2's MXU; zero the f1/f2 staging lanes, ONES_LANE stays 1.0.
    lane = jax.lax.broadcasted_iota(jnp.int32, y.shape, 1)
    keep = jnp.logical_and(lane != C_F1, lane != C_F2)
    seq_ref[...] = jnp.where(keep, y, 0.0).astype(jnp.bfloat16)


# ---------------- kernel 2: masked attention + aggregation ---------------- #

def _attn_kernel(adj_ref, seq_ref, f1_ref, m_ref, f2_ref, bias_ref, out_ref,
                 *, alpha, tn, seq_resident):
    # adj:  [TM, TN] int8 edge counts   seq: bf16 ([N_cols, F_PAD] resident or [TN, F_PAD])
    # f1/m: [TM, 1] f32                  f2: [1, TN] f32       bias: [1, F_PAD] f32
    j = pl.program_id(1)

    @pl.when(j == 0)
    def _():
        out_ref[...] = jnp.zeros_like(out_ref)   # out block is resident across j

    # logits[i, j] = f1[i] + f2[j]   (densified f_1[edges[0]] + f_2[edges[1]])
    logits = f1_ref[...] + f2_ref[...]                       # [TM, TN]
    lrelu = jnp.maximum(logits, alpha * logits)              # leaky_relu (alpha in (0,1))
    # exp with per-row shift m (cancels in normalization, keeps exp <= 1), weighted by
    # the int8 edge counts.
    coefs = jnp.exp(lrelu - m_ref[...]) * adj_ref[...].astype(jnp.float32)
    p = coefs.astype(jnp.bfloat16)                           # bf16 LHS -> full MXU rate

    if seq_resident:
        start = pl.multiple_of(j * tn, tn)
        seq = seq_ref[pl.ds(start, tn), :]
    else:
        seq = seq_ref[...]
    # seq's ONES_LANE column is 1.0, so acc[:, ONES_LANE] accumulates the coef row-sum.
    out_ref[...] += jnp.dot(p, seq, preferred_element_type=jnp.float32)

    @pl.when(j == pl.num_programs(1) - 1)
    def _():
        acc = out_ref[...]
        csum = acc[:, ONES_LANE:ONES_LANE + 1]
        # Guard degree-0 rows (original torch would produce NaN there).
        denom = jnp.maximum(csum, 1e-30)
        out_ref[...] = acc / denom + bias_ref[...]


# ------------------------------ wrapper ----------------------------------- #

def sparse_gat_forward(x, edges, params, *, alpha=0.2, concat=False,
                       tm=512, tn=1024, tm_feat=512):
    """x: [N, in_features] f32, edges: [2, E] int32 (edges[0]=src, edges[1]=dst)."""
    n, f_in = x.shape
    f_out = params["w_seq"].shape[0]
    assert f_out <= ONES_LANE, "out_features must leave room for the ones/f1/f2 lanes"
    hi = jax.lax.Precision.HIGHEST

    # Decoupled row / column padding (no lcm blow-up).  int8 adj rows need tm % 32 == 0.
    tm = max(32, min(tm, _round_up(n, 32)))
    tn = max(128, min(tn, _round_up(n, 128)))
    n_rows = _round_up(n, tm)
    n_cols = _round_up(n, tn)
    tm_feat = max(128, min(tm_feat, _round_up(max(n_rows, n_cols), 128)))
    n_nodes = _round_up(max(n_rows, n_cols), tm_feat)

    # x augmented with a constant-1 column (drives biases / ones-lane through the matmul).
    x_aug = jnp.zeros((n_nodes, f_in + 1), jnp.float32)
    x_aug = x_aug.at[:n, :f_in].set(x.astype(jnp.float32))
    x_aug = x_aug.at[:, f_in].set(1.0)

    # Fused weight (one-time wrapper cost, exact in f32):
    #   W_comb = W_lin^T @ W_seq^T ; f1/f2 columns = W_comb @ w_f{1,2}^T ; biases in the
    #   ones row ; ONES_LANE column = [0,...,0,1].
    w_comb = jnp.dot(params["w_lin"].T, params["w_seq"].T, precision=hi)   # [F_in, F_out]
    w_aug = jnp.zeros((f_in + 1, F_PAD), jnp.float32)
    w_aug = w_aug.at[:f_in, :f_out].set(w_comb)
    w_aug = w_aug.at[:f_in, C_F1].set(jnp.dot(w_comb, params["w_f1"].T, precision=hi)[:, 0])
    w_aug = w_aug.at[:f_in, C_F2].set(jnp.dot(w_comb, params["w_f2"].T, precision=hi)[:, 0])
    w_aug = w_aug.at[f_in, ONES_LANE].set(1.0)
    w_aug = w_aug.at[f_in, C_F1].set(params["b_f1"][0, 0])
    w_aug = w_aug.at[f_in, C_F2].set(params["b_f2"][0, 0])

    bias_pad = jnp.zeros((1, F_PAD), jnp.float32).at[:, :f_out].set(params["bias"])

    # ---- kernel 1: fused seq_fts / f1 / f2 (single matmul, row-tiled) ----- #
    seq_all, f1_all, f2_all = pl.pallas_call(
        _feat_kernel,
        out_shape=(
            jax.ShapeDtypeStruct((n_nodes, F_PAD), jnp.bfloat16),
            jax.ShapeDtypeStruct((n_nodes, 1), jnp.float32),
            jax.ShapeDtypeStruct((n_nodes, 1), jnp.float32),
        ),
        grid=(n_nodes // tm_feat,),
        in_specs=[
            pl.BlockSpec((tm_feat, f_in + 1), lambda i: (i, 0)),
            pl.BlockSpec((f_in + 1, F_PAD), lambda i: (0, 0)),
        ],
        out_specs=(
            pl.BlockSpec((tm_feat, F_PAD), lambda i: (i, 0)),
            pl.BlockSpec((tm_feat, 1), lambda i: (i, 0)),
            pl.BlockSpec((tm_feat, 1), lambda i: (i, 0)),
        ),
        compiler_params=pltpu.CompilerParams(dimension_semantics=("parallel",)),
    )(x_aug, w_aug)

    # Per-row shift m[i] = leaky_relu(f1[i] + max(f2)); max over the PADDED f2 vector
    # (padded entries equal b_f2) so exp(lrelu - m) <= 1 everywhere -> no inf*0 NaN.
    f2_max = jnp.max(f2_all)
    mrow = f1_all + f2_max
    m_all = jnp.maximum(mrow, alpha * mrow)

    f1_rows = f1_all[:n_rows]
    m_rows = m_all[:n_rows]
    seq_cols = seq_all[:n_cols]
    f2_cols = jnp.reshape(f2_all[:n_cols], (1, n_cols))

    # Dense int8 edge counts, built directly in int8 (no f32 N^2 intermediate).
    # Exact for up to 127 duplicate edges per (src, dst) pair.
    adj = jnp.zeros((n_rows, n_cols), jnp.int8)
    adj = adj.at[edges[0], edges[1]].add(jnp.ones(edges.shape[1], jnp.int8))

    # seq_fts fully VMEM-resident when small (DMA'd once; 2 pipeline buffers, bf16),
    # otherwise tiled per column block.
    seq_resident = 2 * n_cols * F_PAD * 2 <= 12 * 1024 * 1024
    if seq_resident:
        seq_spec = pl.BlockSpec((n_cols, F_PAD), lambda i, j: (0, 0))
    else:
        seq_spec = pl.BlockSpec((tn, F_PAD), lambda i, j: (j, 0))

    cost = pl.CostEstimate(
        flops=int(2 * n_rows * n_cols * F_PAD + 6 * n_rows * n_cols),
        transcendentals=int(n_rows) * int(n_cols),
        bytes_accessed=int(n_rows * n_cols                      # int8 adj
                           + n_cols * F_PAD * 2                 # bf16 seq
                           + n_rows * F_PAD * 4                 # f32 out
                           + 3 * n_rows * 4 + n_cols * 4),
    )

    out_pad = pl.pallas_call(
        functools.partial(_attn_kernel, alpha=alpha, tn=tn, seq_resident=seq_resident),
        out_shape=jax.ShapeDtypeStruct((n_rows, F_PAD), jnp.float32),
        grid=(n_rows // tm, n_cols // tn),
        in_specs=[
            pl.BlockSpec((tm, tn), lambda i, j: (i, j)),       # adj   int8
            seq_spec,                                          # seq   bf16
            pl.BlockSpec((tm, 1), lambda i, j: (i, 0)),        # f1
            pl.BlockSpec((tm, 1), lambda i, j: (i, 0)),        # m (row shift)
            pl.BlockSpec((1, tn), lambda i, j: (0, j)),        # f2 (row layout)
            pl.BlockSpec((1, F_PAD), lambda i, j: (0, 0)),     # bias
        ],
        out_specs=pl.BlockSpec((tm, F_PAD), lambda i, j: (i, 0)),
        compiler_params=pltpu.CompilerParams(
            dimension_semantics=("parallel", "arbitrary"),
            vmem_limit_bytes=32 * 1024 * 1024,                 # fits v5e/v6e/v7x with headroom
        ),
        cost_estimate=cost,
    )(adj, seq_cols, f1_rows, m_rows, f2_cols, bias_pad)

    ret = out_pad[:n, :f_out]
    return jax.nn.elu(ret) if concat else ret


# ----------------------- deterministic parameter init --------------------- #

def init_params(key, in_features, feat_reduce_dim, out_features):
    k_lin, k_seq, k_f1, k_f2, k_b1, k_b2 = jax.random.split(key, 6)

    # xavier_uniform with gain = calculate_gain('leaky_relu') = sqrt(2/(1+0.01^2))
    gain = float(np.sqrt(2.0 / (1.0 + 0.01 ** 2)))
    bound = gain * float(np.sqrt(6.0 / (in_features + feat_reduce_dim)))
    w_lin = jax.random.uniform(k_lin, (feat_reduce_dim, in_features),
                               jnp.float32, -bound, bound)

    def _unif(k, shape, fan_in):
        b = 1.0 / float(np.sqrt(fan_in))
        return jax.random.uniform(k, shape, jnp.float32, -b, b)

    return {
        "w_lin": w_lin,                                              # [F_red, F_in]
        "w_seq": _unif(k_seq, (out_features, feat_reduce_dim), feat_reduce_dim),
        "w_f1": _unif(k_f1, (1, out_features), out_features),        # [1, F_out]
        "b_f1": _unif(k_b1, (1, 1), out_features),
        "w_f2": _unif(k_f2, (1, out_features), out_features),
        "b_f2": _unif(k_b2, (1, 1), out_features),
        "bias": jnp.zeros((1, out_features), jnp.float32),           # nn.Parameter zeros
    }


# --------------------------- pure-JAX reference ---------------------------- #

def reference_forward(x, edges, params, *, alpha=0.2, concat=False):
    hi = jax.lax.Precision.HIGHEST
    n = x.shape[0]
    x_red = jnp.dot(x, params["w_lin"].T, precision=hi)
    seq_fts = jnp.dot(x_red, params["w_seq"].T, precision=hi)
    f1 = (jnp.dot(seq_fts, params["w_f1"].T, precision=hi) + params["b_f1"])[:, 0]
    f2 = (jnp.dot(seq_fts, params["w_f2"].T, precision=hi) + params["b_f2"])[:, 0]
    logits = f1[edges[0]] + f2[edges[1]]
    coefs = jnp.exp(jnp.where(logits > 0, logits, alpha * logits))
    coef_sum = jnp.zeros((n,), jnp.float32).at[edges[0]].add(coefs)
    agg = jnp.zeros_like(seq_fts).at[edges[0]].add(coefs[:, None] * seq_fts[edges[1]])
    ret = agg / coef_sum[:, None] + params["bias"]
    return jax.nn.elu(ret) if concat else ret


# --------------------------------- main ------------------------------------ #

if __name__ == "__main__":
    N, IN_FEATURES, FEAT_REDUCE_DIM, OUT_FEATURES = 16, 32, 16, 8
    E_RAND = 48

    key = jax.random.PRNGKey(0)
    k_x, k_src, k_dst, k_param = jax.random.split(key, 4)

    x = jax.random.normal(k_x, (N, IN_FEATURES), jnp.float32)

    # random edges + self-loops (every node has >=1 outgoing edge, so coef_sum > 0)
    src = jax.random.randint(k_src, (E_RAND,), 0, N, jnp.int32)
    dst = jax.random.randint(k_dst, (E_RAND,), 0, N, jnp.int32)
    loops = jnp.arange(N, dtype=jnp.int32)
    edges = jnp.stack([jnp.concatenate([src, loops]),
                       jnp.concatenate([dst, loops])])       # [2, E]

    params = init_params(k_param, IN_FEATURES, FEAT_REDUCE_DIM, OUT_FEATURES)

    fwd = jax.jit(functools.partial(sparse_gat_forward, alpha=0.2, concat=False))
    out = jax.block_until_ready(fwd(x, edges, params))

    ref = reference_forward(x, edges, params, alpha=0.2, concat=False)

    assert out.shape == (N, OUT_FEATURES)
    assert bool(jnp.all(jnp.isfinite(out)))
    # Tolerance loosened vs the pure-f32 version: coefs and seq_fts go through bf16
    # for the MXU matmul in kernel 2 (accumulation stays f32).
    assert bool(jnp.allclose(out, ref, atol=3e-2, rtol=3e-2)), "mismatch vs reference"

    print("KERNEL_OK")
</pallas_src>

<mosaic_0001>
module attributes {stable_mosaic.version = 11 : i64} {
  func.func @_feat_kernel(%arg0: i32, %arg1: memref<128x33xf32, #tpu.memory_space<vmem>>, %arg2: memref<33x128xf32, #tpu.memory_space<vmem>>, %arg3: memref<128x128xbf16, #tpu.memory_space<vmem>>, %arg4: memref<128x1xf32, #tpu.memory_space<vmem>>, %arg5: memref<128x1xf32, #tpu.memory_space<vmem>>) attributes {dimension_semantics = [#tpu.dimension_semantics<parallel>], iteration_bounds = array<i64: 1>, scalar_prefetch = 0 : i64, scratch_operands = 0 : i64, tpu.core_type = #tpu.core_type<tc>, window_params = [{transform_indices = @transform_0, window_bounds = array<i64: 128, 33>}, {pipeline_mode = #tpu.pipeline_mode<synchronous>, transform_indices = @transform_1, window_bounds = array<i64: 33, 128>}, {transform_indices = @transform_2, window_bounds = array<i64: 128, 128>}, {transform_indices = @transform_3, window_bounds = array<i64: 128, 1>}, {transform_indices = @transform_4, window_bounds = array<i64: 128, 1>}]} {
    %c0 = arith.constant 0 : index
    %c0_0 = arith.constant 0 : index
    %0 = vector.load %arg1[%c0, %c0_0] : memref<128x33xf32, #tpu.memory_space<vmem>>, vector<128x33xf32>
    %c0_1 = arith.constant 0 : index
    %c0_2 = arith.constant 0 : index
    %1 = vector.load %arg2[%c0_1, %c0_2] : memref<33x128xf32, #tpu.memory_space<vmem>>, vector<33x128xf32>
    %cst = arith.constant dense<0.000000e+00> : vector<128x128xf32>
    %2 = tpu.matmul %0, %1, %cst {dimension_numbers = #tpu.dot_dimension_numbers<[1], [0], [0], [1], [0, 0, 1, 1], [], []>} : vector<128x33xf32>, vector<33x128xf32>, vector<128x128xf32> -> vector<128x128xf32>
    %3 = vector.extract_strided_slice %2 {offsets = [0, 126], sizes = [128, 1], strides = [1, 1]} : vector<128x128xf32> to vector<128x1xf32>
    %c0_3 = arith.constant 0 : index
    %c0_4 = arith.constant 0 : index
    %4 = vector.load %arg4[%c0_3, %c0_4] : memref<128x1xf32, #tpu.memory_space<vmem>>, vector<128x1xf32>
    tpu.vector_store %arg4[%c0_3, %c0_4], %3 {strides = array<i32>} : memref<128x1xf32, #tpu.memory_space<vmem>>, vector<128x1xf32>,
    %5 = vector.extract_strided_slice %2 {offsets = [0, 127], sizes = [128, 1], strides = [1, 1]} : vector<128x128xf32> to vector<128x1xf32>
    %c0_5 = arith.constant 0 : index
    %c0_6 = arith.constant 0 : index
    %6 = vector.load %arg5[%c0_5, %c0_6] : memref<128x1xf32, #tpu.memory_space<vmem>>, vector<128x1xf32>
    tpu.vector_store %arg5[%c0_5, %c0_6], %5 {strides = array<i32>} : memref<128x1xf32, #tpu.memory_space<vmem>>, vector<128x1xf32>,
    %7 = tpu.iota {dimensions = array<i32: 1>} : vector<128x128xi32>
    %c126_i32 = arith.constant 126 : i32
    %8 = vector.broadcast %c126_i32 : i32 to vector<128x128xi32>
    %9 = arith.cmpi ne, %7, %8 : vector<128x128xi32>
    %c127_i32 = arith.constant 127 : i32
    %10 = vector.broadcast %c127_i32 : i32 to vector<128x128xi32>
    %11 = arith.cmpi ne, %7, %10 : vector<128x128xi32>
    %12 = arith.andi %9, %11 : vector<128x128xi1>
    %cst_7 = arith.constant 0.000000e+00 : f32
    %13 = vector.broadcast %cst_7 : f32 to vector<128x128xf32>
    %14 = arith.select %12, %2, %13 : vector<128x128xi1>, vector<128x128xf32>
    %15 = arith.truncf %14 : vector<128x128xf32> to vector<128x128xbf16>
    %c0_8 = arith.constant 0 : index
    %c0_9 = arith.constant 0 : index
    %16 = vector.load %arg3[%c0_8, %c0_9] : memref<128x128xbf16, #tpu.memory_space<vmem>>, vector<128x128xbf16>
    tpu.vector_store %arg3[%c0_8, %c0_9], %15 {strides = array<i32>} : memref<128x128xbf16, #tpu.memory_space<vmem>>, vector<128x128xbf16>,
    return
  }
  func.func @transform_0(%arg0: i32) -> (i32, i32) {
    %c0_i32 = arith.constant 0 : i32
    %c0_i32_0 = arith.constant 0 : i32
    return %arg0, %c0_i32 : i32, i32
  }
  func.func @transform_1(%arg0: i32) -> (i32, i32) {
    %c0_i32 = arith.constant 0 : i32
    %c0_i32_0 = arith.constant 0 : i32
    %c0_i32_1 = arith.constant 0 : i32
    return %c0_i32, %c0_i32_0 : i32, i32
  }
  func.func @transform_2(%arg0: i32) -> (i32, i32) {
    %c0_i32 = arith.constant 0 : i32
    %c0_i32_0 = arith.constant 0 : i32
    return %arg0, %c0_i32 : i32, i32
  }
  func.func @transform_3(%arg0: i32) -> (i32, i32) {
    %c0_i32 = arith.constant 0 : i32
    %c0_i32_0 = arith.constant 0 : i32
    return %arg0, %c0_i32 : i32, i32
  }
  func.func @transform_4(%arg0: i32) -> (i32, i32) {
    %c0_i32 = arith.constant 0 : i32
    %c0_i32_0 = arith.constant 0 : i32
    return %arg0, %c0_i32 : i32, i32
  }
}

module attributes {stable_mosaic.version = 11 : i64} {
  func.func @_attn_kernel(%arg0: i32, %arg1: i32, %arg2: memref<32x128xi8, #tpu.memory_space<vmem>>, %arg3: memref<128x128xbf16, #tpu.memory_space<vmem>>, %arg4: memref<32x1xf32, #tpu.memory_space<vmem>>, %arg5: memref<32x1xf32, #tpu.memory_space<vmem>>, %arg6: memref<1x128xf32, #tpu.memory_space<vmem>>, %arg7: memref<1x128xf32, #tpu.memory_space<vmem>>, %arg8: memref<32x128xf32, #tpu.memory_space<vmem>>) attributes {dimension_semantics = [#tpu.dimension_semantics<parallel>, #tpu.dimension_semantics<arbitrary>], iteration_bounds = array<i64: 1, 1>, scalar_prefetch = 0 : i64, scratch_operands = 0 : i64, tpu.core_type = #tpu.core_type<tc>, window_params = [{transform_indices = @transform_0, window_bounds = array<i64: 32, 128>}, {pipeline_mode = #tpu.pipeline_mode<synchronous>, transform_indices = @transform_1, window_bounds = array<i64: 128, 128>}, {transform_indices = @transform_2, window_bounds = array<i64: 32, 1>}, {transform_indices = @transform_3, window_bounds = array<i64: 32, 1>}, {transform_indices = @transform_4, window_bounds = array<i64: 1, 128>}, {pipeline_mode = #tpu.pipeline_mode<synchronous>, transform_indices = @transform_5, window_bounds = array<i64: 1, 128>}, {transform_indices = @transform_6, window_bounds = array<i64: 32, 128>}]} {
    %c0_i32 = arith.constant 0 : i32
    %0 = arith.cmpi eq, %arg1, %c0_i32 : i32
    %1 = arith.extui %0 : i1 to i32
    %c0_i32_0 = arith.constant 0 : i32
    %2 = arith.cmpi ne, %1, %c0_i32_0 : i32
    scf.if %2 {
      %cst_16 = arith.constant 0.000000e+00 : f32
      %30 = vector.broadcast %cst_16 : f32 to vector<32x128xf32>
      %c0_17 = arith.constant 0 : index
      %c0_18 = arith.constant 0 : index
      %31 = vector.load %arg8[%c0_17, %c0_18] : memref<32x128xf32, #tpu.memory_space<vmem>>, vector<32x128xf32>
      tpu.vector_store %arg8[%c0_17, %c0_18], %30 {strides = array<i32>} : memref<32x128xf32, #tpu.memory_space<vmem>>, vector<32x128xf32>,
    } else {
    }
    %c0 = arith.constant 0 : index
    %c0_1 = arith.constant 0 : index
    %3 = vector.load %arg4[%c0, %c0_1] : memref<32x1xf32, #tpu.memory_space<vmem>>, vector<32x1xf32>
    %c0_2 = arith.constant 0 : index
    %c0_3 = arith.constant 0 : index
    %4 = vector.load %arg6[%c0_2, %c0_3] : memref<1x128xf32, #tpu.memory_space<vmem>>, vector<1x128xf32>
    %5 = vector.broadcast %3 : vector<32x1xf32> to vector<32x128xf32>
    %6 = vector.broadcast %4 : vector<1x128xf32> to vector<32x128xf32>
    %7 = arith.addf %5, %6 : vector<32x128xf32>
    %cst = arith.constant 2.000000e-01 : f32
    %8 = vector.broadcast %cst : f32 to vector<32x128xf32>
    %9 = arith.mulf %8, %7 : vector<32x128xf32>
    %10 = arith.maximumf %7, %9 : vector<32x128xf32>
    %c0_4 = arith.constant 0 : index
    %c0_5 = arith.constant 0 : index
    %11 = vector.load %arg5[%c0_4, %c0_5] : memref<32x1xf32, #tpu.memory_space<vmem>>, vector<32x1xf32>
    %12 = vector.broadcast %11 : vector<32x1xf32> to vector<32x128xf32>
    %13 = arith.subf %10, %12 : vector<32x128xf32>
    %14 = math.exp %13 : vector<32x128xf32>
    %c0_6 = arith.constant 0 : index
    %c0_7 = arith.constant 0 : index
    %15 = vector.load %arg2[%c0_6, %c0_7] : memref<32x128xi8, #tpu.memory_space<vmem>>, vector<32x128xi8>
    %16 = arith.sitofp %15 : vector<32x128xi8> to vector<32x128xf32>
    %17 = arith.mulf %14, %16 : vector<32x128xf32>
    %18 = arith.truncf %17 : vector<32x128xf32> to vector<32x128xbf16>
    %c128_i32 = arith.constant 128 : i32
    %19 = arith.muli %arg1, %c128_i32 : i32
    %20 = tpu.assume_multiple %19, 128 : i32
    %21 = arith.index_cast %20 : i32 to index
    %c0_8 = arith.constant 0 : index
    %22 = vector.load %arg3[%21, %c0_8] : memref<128x128xbf16, #tpu.memory_space<vmem>>, vector<128x128xbf16>
    %c0_9 = arith.constant 0 : index
    %c0_10 = arith.constant 0 : index
    %23 = vector.load %arg8[%c0_9, %c0_10] : memref<32x128xf32, #tpu.memory_space<vmem>>, vector<32x128xf32>
    %cst_11 = arith.constant dense<0.000000e+00> : vector<32x128xf32>
    %24 = tpu.matmul %18, %22, %cst_11 {dimension_numbers = #tpu.dot_dimension_numbers<[1], [0], [0], [1], [0, 0, 1, 1], [], []>} : vector<32x128xbf16>, vector<128x128xbf16>, vector<32x128xf32> -> vector<32x128xf32>
    %25 = arith.addf %23, %24 : vector<32x128xf32>
    %c0_12 = arith.constant 0 : index
    %c0_13 = arith.constant 0 : index
    %26 = vector.load %arg8[%c0_12, %c0_13] : memref<32x128xf32, #tpu.memory_space<vmem>>, vector<32x128xf32>
    tpu.vector_store %arg8[%c0_12, %c0_13], %25 {strides = array<i32>} : memref<32x128xf32, #tpu.memory_space<vmem>>, vector<32x128xf32>,
    %c0_i32_14 = arith.constant 0 : i32
    %27 = arith.cmpi eq, %arg1, %c0_i32_14 : i32
    %28 = arith.extui %27 : i1 to i32
    %c0_i32_15 = arith.constant 0 : i32
    %29 = arith.cmpi ne, %28, %c0_i32_15 : i32
    scf.if %29 {
      %c0_16 = arith.constant 0 : index
      %c0_17 = arith.constant 0 : index
      %30 = vector.load %arg8[%c0_16, %c0_17] : memref<32x128xf32, #tpu.memory_space<vmem>>, vector<32x128xf32>
      %31 = vector.extract_strided_slice %30 {offsets = [0, 125], sizes = [32, 1], strides = [1, 1]} : vector<32x128xf32> to vector<32x1xf32>
      %cst_18 = arith.constant 1.000000e-30 : f32
      %32 = vector.broadcast %cst_18 : f32 to vector<32x1xf32>
      %33 = arith.maximumf %31, %32 : vector<32x1xf32>
      %34 = vector.broadcast %33 : vector<32x1xf32> to vector<32x128xf32>
      %35 = arith.divf %30, %34 : vector<32x128xf32>
      %c0_19 = arith.constant 0 : index
      %c0_20 = arith.constant 0 : index
      %36 = vector.load %arg7[%c0_19, %c0_20] : memref<1x128xf32, #tpu.memory_space<vmem>>, vector<1x128xf32>
      %37 = vector.broadcast %36 : vector<1x128xf32> to vector<32x128xf32>
      %38 = arith.addf %35, %37 : vector<32x128xf32>
      %c0_21 = arith.constant 0 : index
      %c0_22 = arith.constant 0 : index
      %39 = vector.load %arg8[%c0_21, %c0_22] : memref<32x128xf32, #tpu.memory_space<vmem>>, vector<32x128xf32>
      tpu.vector_store %arg8[%c0_21, %c0_22], %38 {strides = array<i32>} : memref<32x128xf32, #tpu.memory_space<vmem>>, vector<32x128xf32>,
    } else {
    }
    return
  }
  func.func @transform_0(%arg0: i32, %arg1: i32) -> (i32, i32) {
    %c0_i32 = arith.constant 0 : i32
    return %arg0, %arg1 : i32, i32
  }
  func.func @transform_1(%arg0: i32, %arg1: i32) -> (i32, i32) {
    %c0_i32 = arith.constant 0 : i32
    %c0_i32_0 = arith.constant 0 : i32
    %c0_i32_1 = arith.constant 0 : i32
    return %c0_i32, %c0_i32_0 : i32, i32
  }
  func.func @transform_2(%arg0: i32, %arg1: i32) -> (i32, i32) {
    %c0_i32 = arith.constant 0 : i32
    %c0_i32_0 = arith.constant 0 : i32
    return %arg0, %c0_i32 : i32, i32
  }
  func.func @transform_3(%arg0: i32, %arg1: i32) -> (i32, i32) {
    %c0_i32 = arith.constant 0 : i32
    %c0_i32_0 = arith.constant 0 : i32
    return %arg0, %c0_i32 : i32, i32
  }
  func.func @transform_4(%arg0: i32, %arg1: i32) -> (i32, i32) {
    %c0_i32 = arith.constant 0 : i32
    %c0_i32_0 = arith.constant 0 : i32
    return %c0_i32, %arg1 : i32, i32
  }
  func.func @transform_5(%arg0: i32, %arg1: i32) -> (i32, i32) {
    %c0_i32 = arith.constant 0 : i32
    %c0_i32_0 = arith.constant 0 : i32
    %c0_i32_1 = arith.constant 0 : i32
    return %c0_i32, %c0_i32_0 : i32, i32
  }
  func.func @transform_6(%arg0: i32, %arg1: i32) -> (i32, i32) {
    %c0_i32 = arith.constant 0 : i32
    %c0_i32_0 = arith.constant 0 : i32
    return %arg0, %c0_i32 : i32, i32
  }
}

</mosaic_0001>

<bundles_post_ra>
// kernel: sparse_gat_forward.2
= control target key start
LH: loop header
LB: loop body
LE: loop exit
PB: predicated region body
PF: predicated region fallthrough
CT: control target
= control target key end

     0   :  { %vm84_vm0 = vcmask 1040384   ;;  %vm35_vm1 = vcmask 269312   ;;  %v298_v21 = vlaneseq  ;;  %s444_s30 = smov 1   ;;  %vm217_vm5 = vcmask 7168   ;;  %s770_s1 = inlined_call_operand.vmem [shape: f32[33,128], index: 1, kind: input, shape index: {}]   ;;  %s771_s0 = inlined_call_operand.vmem [shape: f32[128,33], index: 0, kind: input, shape index: {}]   ;;  %s772_s2 = inlined_call_operand.vmem [shape: bf16[128,128], index: 2, kind: output, shape index: {0}]   ;;  %s773_s3 = inlined_call_operand.vmem [shape: f32[128,1], index: 3, kind: output, shape index: {1}]   ;;  %s774_s4 = inlined_call_operand.vmem [shape: f32[128,1], index: 4, kind: output, shape index: {2}]  }
   0x1   :  { %v34_v0 = vld [vmem:[%s770_s1 + $0x20] sm:$0x1]  ;;  %v33_v1 = vld [vmem:[%s770_s1 + $0x18] sm:$0xff]  ;;  %v32_v2 = vld [vmem:[%s770_s1 + $0x10] sm:$0xff] }
   0x2   :  { %363 = vmatpush.msk.msra.mxu0 %vm84_vm0, %v34_v0  ;;  %427 = vmatpush.msk.msra.mxu1 %vm84_vm0, %v34_v0  ;;  %v31_v3 = vld [vmem:[%s770_s1 + $0x8] sm:$0xff]  ;;  %v30_v4 = vld [vmem:[%s770_s1] sm:$0xff]  ;;  %v16_v13 = vld [vmem:[%s771_s0 + $0x10] sm:$0xff]  ;;  %v299_v22 = vand.u32 127, %v298_v21  ;;  %s445_s1 = smov 2  }
   0x3   :  { %429 = vmatpush.msk.msra.mxu3 %vm84_vm0, %v34_v0  ;;  %428 = vmatpush.msk.msra.mxu2 %vm84_vm0, %v34_v0  ;;  %v14_v5 = vld [vmem:[%s771_s0] sm:$0xff]  ;;  %v15_v9 = vld [vmem:[%s771_s0 + $0x8] sm:$0xff]  ;;  %v20_v14 = vld [vmem:[%s771_s0 + $0x30] sm:$0xff] }
   0x4   :  { %100 = vmatpush.msra.mxu0 %v33_v1  ;;  %430 = vmatpush.msra.mxu1 %v33_v1  ;;  %v18_v6 = vld [vmem:[%s771_s0 + $0x20] sm:$0xff]  ;;  %v27_v10 = vld [vmem:[%s771_s0 + $0x68] sm:$0xff]  ;;  %v28_v15 = vld [vmem:[%s771_s0 + $0x70] sm:$0xff]  ;;  %vm300_vm2 = vcmp.ne.s32.totalorder %v299_v22, 126  ;;  %vm301_vm3 = vcmp.ne.s32.totalorder %v299_v22, 127 }
   0x5   :  { %432 = vmatpush.msra.mxu3 %v33_v1  ;;  %431 = vmatpush.msra.mxu2 %v33_v1  ;;  %v26_v7 = vld [vmem:[%s771_s0 + $0x60] sm:$0xff]  ;;  %v19_v11 = vld [vmem:[%s771_s0 + $0x28] sm:$0xff]  ;;  %v24_v16 = vld [vmem:[%s771_s0 + $0x50] sm:$0xff] }
   0x6   :  { %101 = vmatpush.msra.mxu0 %v32_v2  ;;  %433 = vmatpush.msra.mxu1 %v32_v2  ;;  %v22_v8 = vld [vmem:[%s771_s0 + $0x40] sm:$0xff]  ;;  %v23_v12 = vld [vmem:[%s771_s0 + $0x48] sm:$0xff]  ;;  %v17_v17 = vld [vmem:[%s771_s0 + $0x18] sm:$0xff] }
   0x7   :  { %435 = vmatpush.msra.mxu3 %v32_v2  ;;  %434 = vmatpush.msra.mxu2 %v32_v2  ;;  %v21_v18 = vld [vmem:[%s771_s0 + $0x38] sm:$0xff]  ;;  %vm553_vm4 = vmand %vm300_vm2, %vm301_vm3 }
   0x8   :  { %102 = vmatpush.msra.mxu0 %v31_v3  ;;  %436 = vmatpush.msra.mxu1 %v31_v3  ;;  %v29_v19 = vld [vmem:[%s771_s0 + $0x78] sm:$0xff] }
   0x9   :  { %438 = vmatpush.msra.mxu3 %v31_v3  ;;  %437 = vmatpush.msra.mxu2 %v31_v3  ;;  %v25_v20 = vld [vmem:[%s771_s0 + $0x58] sm:$0xff] }
   0xa   :  { %103 = vmatpush.msra.mxu0 %v30_v4  ;;  %439 = vmatpush.msra.mxu1 %v30_v4 }
   0xb   :  { %441 = vmatpush.msra.mxu3 %v30_v4  ;;  %364 = vmatmul.msk.f32.vlgmr.msra.gmra.mxu0 %vm35_vm1, %v14_v5 }
   0xc   :  { %368 = vmatmul.msk.f32.vlgmr.msra.gmra.mxu1 %vm35_vm1, %v18_v6  ;;  %376 = vmatmul.msk.f32.vlgmr.msra.gmra.mxu3 %vm35_vm1, %v26_v7 }
   0xd   :  { %440 = vmatpush.msra.mxu2 %v30_v4 }
   0xe   :  { %372 = vmatmul.msk.f32.vlgmr.msra.gmra.mxu2 %vm35_vm1, %v22_v8 }
  0x13   :  { %365 = vmatmul.msk.f32.gmra.mxu0 %vm35_vm1, %v15_v9 }
  0x14   :  { %377 = vmatmul.msk.f32.gmra.mxu3 %vm35_vm1, %v27_v10  ;;  %369 = vmatmul.msk.f32.gmra.mxu1 %vm35_vm1, %v19_v11 }
  0x16   :  { %373 = vmatmul.msk.f32.gmra.mxu2 %vm35_vm1, %v23_v12 }
  0x1b   :  { %366 = vmatmul.msk.f32.gmra.mxu0 %vm35_vm1, %v16_v13 }
  0x1c   :  { %370 = vmatmul.msk.f32.gmra.mxu1 %vm35_vm1, %v20_v14  ;;  %378 = vmatmul.msk.f32.gmra.mxu3 %vm35_vm1, %v28_v15 }
  0x1e   :  { %374 = vmatmul.msk.f32.gmra.mxu2 %vm35_vm1, %v24_v16 }
  0x23   :  { %367 = vmatmul.msk.f32.gmra.mxu0 %vm35_vm1, %v17_v17 }
  0x24   :  { %371 = vmatmul.msk.f32.gmra.mxu1 %vm35_vm1, %v21_v18  ;;  %379 = vmatmul.msk.f32.gmra.mxu3 %vm35_vm1, %v29_v19 }
  0x26   :  { %375 = vmatmul.msk.f32.gmra.mxu2 %vm35_vm1, %v25_v20 }
  0x88   :  { %v105_v23 = vpop.f32.mrf.mxu0 }
  0x89   :  { %v117_v24 = vpop.f32.mrf.mxu1  ;;  %234 = vrot.lane.b32.xlu1 %v105_v23, %s444_s30  ;;  %169 = vrot.lane.b32.xlu0 %v105_v23, %s445_s1  ;;  %v303_v29 = vsel %vm553_vm4, %v105_v23, 0.0 }
  0x8a   :  { %177 = vrot.lane.b32.xlu2 %v117_v24, %s445_s1  ;;  %v307_v27 = vsel %vm553_vm4, %v117_v24, 0.0 }
  0x8f   :  { %v141_v26 = vpop.f32.mrf.mxu3 }
  0x90   :  { %v108_v28 = vpop.f32.mrf.mxu0  ;;  %v315_v37 = vsel %vm553_vm4, %v141_v26, 0.0 }
  0x91   :  { %v304_v30 = vsel %vm553_vm4, %v108_v28, 0.0  ;;  %v129_v31 = vpop.f32.mrf.mxu2  ;;  %258 = vrot.lane.b32.xlu1 %v141_v26, %s444_s30  ;;  %193 = vrot.lane.b32.xlu0 %v141_v26, %s445_s1  ;;  %v120_v32 = vpop.f32.mrf.mxu1 }
  0x92   :  { %v383_v33 = vpack.c.bf16 %v304_v30, %v303_v29  ;;  %242 = vrot.lane.b32.xlu2 %v117_v24, %s444_s30  ;;  %v308_v34 = vsel %vm553_vm4, %v120_v32, 0.0  ;;  %v311_v38 = vsel %vm553_vm4, %v129_v31, 0.0 }
  0x93   :  { %v393_v35 = vpack.c.bf16 %v308_v34, %v307_v27 }
  0x94   :  { %384 = vst [vmem:[%s772_s2] sm:$0xff] %v383_v33  }
  0x95   :  { %421 = vst [vmem:[%s772_s2 + $0x10] sm:$0xff] %v393_v35  }
  0x97   :  { %v144_v36 = vpop.f32.mrf.mxu3 }
  0x98   :  { %v316_v39 = vsel %vm553_vm4, %v144_v36, 0.0  ;;  %v111_v40 = vpop.f32.mrf.mxu0 }
  0x99   :  { %v413_v41 = vpack.c.bf16 %v316_v39, %v315_v37  ;;  %v132_v42 = vpop.f32.mrf.mxu2  ;;  %195 = vrot.lane.b32.xlu1 %v144_v36, %s445_s1  ;;  %250 = vrot.lane.b32.xlu0 %v129_v31, %s444_s30  ;;  %v123_v43 = vpop.f32.mrf.mxu1  ;;  %v305_v46 = vsel %vm553_vm4, %v111_v40, 0.0 }
  0x9a   :  { %v312_v44 = vsel %vm553_vm4, %v132_v42, 0.0  ;;  %185 = vrot.lane.b32.xlu2 %v129_v31, %s445_s1  ;;  %v309_v49 = vsel %vm553_vm4, %v123_v43, 0.0 }
  0x9b   :  { %425 = vst [vmem:[%s772_s2 + $0x30] sm:$0xff] %v413_v41   ;;  %v403_v45 = vpack.c.bf16 %v312_v44, %v311_v38 }
  0x9d   :  { %423 = vst [vmem:[%s772_s2 + $0x20] sm:$0xff] %v403_v45  }
  0x9f   :  { %v147_v47 = vpop.f32.mrf.mxu3 }
  0xa0   :  { %v114_v48 = vpop.f32.mrf.mxu0  ;;  %v317_v56 = vsel %vm553_vm4, %v147_v47, 0.0 }
  0xa1   :  { %252 = vrot.lane.b32.xlu1 %v132_v42, %s444_s30  ;;  %171 = vrot.lane.b32.xlu0 %v108_v28, %s445_s1  ;;  %v306_v50 = vsel %vm553_vm4, %v114_v48, 0.0  ;;  %v126_v51 = vpop.f32.mrf.mxu1  ;;  %v135_v52 = vpop.f32.mrf.mxu2 }
  0xa2   :  { %179 = vrot.lane.b32.xlu2 %v120_v32, %s445_s1  ;;  %v388_v53 = vpack.c.bf16 %v306_v50, %v305_v46  ;;  %v310_v54 = vsel %vm553_vm4, %v126_v51, 0.0  ;;  %v313_v58 = vsel %vm553_vm4, %v135_v52, 0.0 }
  0xa3   :  { %v398_v55 = vpack.c.bf16 %v310_v54, %v309_v49 }
  0xa4   :  { %420 = vst [vmem:[%s772_s2 + $0x8] sm:$0xff] %v388_v53  }
  0xa5   :  { %422 = vst [vmem:[%s772_s2 + $0x18] sm:$0xff] %v398_v55  }
  0xa7   :  { %v150_v57 = vpop.f32.mrf.mxu3 }
  0xa8   :  { %v318_v59 = vsel %vm553_vm4, %v150_v57, 0.0 }
  0xa9   :  { %244 = vrot.lane.b32.xlu0 %v120_v32, %s444_s30  ;;  %173 = vrot.lane.b32.xlu1 %v111_v40, %s445_s1  ;;  %v138_v60 = vpop.f32.mrf.mxu2  ;;  %v418_v61 = vpack.c.bf16 %v318_v59, %v317_v56 }
  0xaa   :  { %236 = vrot.lane.b32.xlu2 %v108_v28, %s444_s30  ;;  %v314_v62 = vsel %vm553_vm4, %v138_v60, 0.0 }
  0xab   :  { %v408_v63 = vpack.c.bf16 %v314_v62, %v313_v58  ;;  %426 = vst [vmem:[%s772_s2 + $0x38] sm:$0xff] %v418_v61  }
  0xad   :  { %424 = vst [vmem:[%s772_s2 + $0x28] sm:$0xff] %v408_v63  }
  0xb1   :  { %187 = vrot.lane.b32.xlu0 %v132_v42, %s445_s1  ;;  %246 = vrot.lane.b32.xlu1 %v123_v43, %s444_s30 }
  0xb2   :  { %197 = vrot.lane.b32.xlu2 %v147_v47, %s445_s1 }
  0xb9   :  { %181 = vrot.lane.b32.xlu0 %v123_v43, %s445_s1  ;;  %189 = vrot.lane.b32.xlu1 %v135_v52, %s445_s1 }
  0xba   :  { %254 = vrot.lane.b32.xlu2 %v135_v52, %s444_s30 }
  0xc1   :  { %238 = vrot.lane.b32.xlu0 %v111_v40, %s444_s30  ;;  %175 = vrot.lane.b32.xlu1 %v114_v48, %s445_s1 }
  0xc2   :  { %248 = vrot.lane.b32.xlu2 %v126_v51, %s444_s30 }
  0xc9   :  { %199 = vrot.lane.b32.xlu0 %v150_v57, %s445_s1  ;;  %183 = vrot.lane.b32.xlu1 %v126_v51, %s445_s1 }
  0xca   :  { %191 = vrot.lane.b32.xlu2 %v138_v60, %s445_s1 }
  0xd1   :  { %256 = vrot.lane.b32.xlu0 %v138_v60, %s444_s30  ;;  %240 = vrot.lane.b32.xlu1 %v114_v48, %s444_s30 }
  0xd2   :  { %260 = vrot.lane.b32.xlu2 %v144_v36, %s444_s30 }
  0xd9   :  { %262 = vrot.lane.b32.xlu0 %v147_v47, %s444_s30  ;;  %264 = vrot.lane.b32.xlu1 %v150_v57, %s444_s30 }
  0xe4   :  { %v178_v0 = vpop.permute.xlu2 %177 }
  0xe5   :  { %222 = vst.msk [vmem:[%s773_s3 + $0x20] sm:$0xff] %vm217_vm5, %v178_v0 }
  0xec   :  { %v243_v1 = vpop.permute.xlu2 %242 }
  0xed   :  { %286 = vst.msk [vmem:[%s774_s4 + $0x20] sm:$0xff] %vm217_vm5, %v243_v1 }
  0xf4   :  { %v186_v2 = vpop.permute.xlu2 %185 }
  0xf5   :  { %226 = vst.msk [vmem:[%s773_s3 + $0x40] sm:$0xff] %vm217_vm5, %v186_v2 }
  0xfb   :  { %v235_v3 = vpop.permute.xlu1 %234  ;;  %v170_v4 = vpop.permute.xlu0 %169 }
  0xfc   :  { %v180_v5 = vpop.permute.xlu2 %179  ;;  %282 = vst.msk [vmem:[%s774_s4] sm:$0xff] %vm217_vm5, %v235_v3 }
  0xfd   :  { %223 = vst.msk [vmem:[%s773_s3 + $0x28] sm:$0xff] %vm217_vm5, %v180_v5 }
  0xfe   :  { %218 = vst.msk [vmem:[%s773_s3] sm:$0xff] %vm217_vm5, %v170_v4 }
 0x103   :  { %v259_v6 = vpop.permute.xlu1 %258  ;;  %v194_v7 = vpop.permute.xlu0 %193 }
 0x104   :  { %294 = vst.msk [vmem:[%s774_s4 + $0x60] sm:$0xff] %vm217_vm5, %v259_v6  ;;  %v237_v8 = vpop.permute.xlu2 %236 }
 0x105   :  { %230 = vst.msk [vmem:[%s773_s3 + $0x60] sm:$0xff] %vm217_vm5, %v194_v7 }
 0x106   :  { %283 = vst.msk [vmem:[%s774_s4 + $0x8] sm:$0xff] %vm217_vm5, %v237_v8 }
 0x10b   :  { %v196_v9 = vpop.permute.xlu1 %195  ;;  %v251_v10 = vpop.permute.xlu0 %250 }
 0x10c   :  { %231 = vst.msk [vmem:[%s773_s3 + $0x68] sm:$0xff] %vm217_vm5, %v196_v9  ;;  %v198_v11 = vpop.permute.xlu2 %197 }
 0x10d   :  { %290 = vst.msk [vmem:[%s774_s4 + $0x40] sm:$0xff] %vm217_vm5, %v251_v10 }
 0x10e   :  { %232 = vst.msk [vmem:[%s773_s3 + $0x70] sm:$0xff] %vm217_vm5, %v198_v11 }
 0x113   :  { %v253_v12 = vpop.permute.xlu1 %252  ;;  %v172_v13 = vpop.permute.xlu0 %171 }
 0x114   :  { %291 = vst.msk [vmem:[%s774_s4 + $0x48] sm:$0xff] %vm217_vm5, %v253_v12  ;;  %v255_v14 = vpop.permute.xlu2 %254 }
 0x115   :  { %292 = vst.msk [vmem:[%s774_s4 + $0x50] sm:$0xff] %vm217_vm5, %v255_v14 }
 0x116   :  { %219 = vst.msk [vmem:[%s773_s3 + $0x8] sm:$0xff] %vm217_vm5, %v172_v13 }
 0x11b   :  { %v245_v15 = vpop.permute.xlu0 %244  ;;  %v174_v16 = vpop.permute.xlu1 %173 }
 0x11c   :  { %v249_v17 = vpop.permute.xlu2 %248  ;;  %287 = vst.msk [vmem:[%s774_s4 + $0x28] sm:$0xff] %vm217_vm5, %v245_v15 }
 0x11d   :  { %289 = vst.msk [vmem:[%s774_s4 + $0x38] sm:$0xff] %vm217_vm5, %v249_v17 }
 0x11e   :  { %220 = vst.msk [vmem:[%s773_s3 + $0x10] sm:$0xff] %vm217_vm5, %v174_v16 }
 0x123   :  { %v188_v18 = vpop.permute.xlu0 %187  ;;  %v247_v19 = vpop.permute.xlu1 %246 }
 0x124   :  { %v192_v20 = vpop.permute.xlu2 %191  ;;  %227 = vst.msk [vmem:[%s773_s3 + $0x48] sm:$0xff] %vm217_vm5, %v188_v18 }
 0x125   :  { %229 = vst.msk [vmem:[%s773_s3 + $0x58] sm:$0xff] %vm217_vm5, %v192_v20 }
 0x126   :  { %288 = vst.msk [vmem:[%s774_s4 + $0x30] sm:$0xff] %vm217_vm5, %v247_v19 }
 0x12b   :  { %v182_v21 = vpop.permute.xlu0 %181  ;;  %v190_v22 = vpop.permute.xlu1 %189 }
 0x12c   :  { %v261_v23 = vpop.permute.xlu2 %260  ;;  %224 = vst.msk [vmem:[%s773_s3 + $0x30] sm:$0xff] %vm217_vm5, %v182_v21 }
 0x12d   :  { %295 = vst.msk [vmem:[%s774_s4 + $0x68] sm:$0xff] %vm217_vm5, %v261_v23 }
 0x12e   :  { %228 = vst.msk [vmem:[%s773_s3 + $0x50] sm:$0xff] %vm217_vm5, %v190_v22 }
 0x133   :  { %v239_v24 = vpop.permute.xlu0 %238  ;;  %v176_v25 = vpop.permute.xlu1 %175 }
 0x134   :  { %284 = vst.msk [vmem:[%s774_s4 + $0x10] sm:$0xff] %vm217_vm5, %v239_v24 }
 0x135   :  { %221 = vst.msk [vmem:[%s773_s3 + $0x18] sm:$0xff] %vm217_vm5, %v176_v25 }
 0x13b   :  { %v200_v26 = vpop.permute.xlu0 %199  ;;  %v184_v27 = vpop.permute.xlu1 %183 }
 0x13c   :  { %233 = vst.msk [vmem:[%s773_s3 + $0x78] sm:$0xff] %vm217_vm5, %v200_v26 }
 0x13d   :  { %225 = vst.msk [vmem:[%s773_s3 + $0x38] sm:$0xff] %vm217_vm5, %v184_v27 }
 0x143   :  { %v257_v28 = vpop.permute.xlu0 %256  ;;  %v241_v29 = vpop.permute.xlu1 %240 }
 0x144   :  { %293 = vst.msk [vmem:[%s774_s4 + $0x58] sm:$0xff] %vm217_vm5, %v257_v28 }
 0x145   :  { %285 = vst.msk [vmem:[%s774_s4 + $0x18] sm:$0xff] %vm217_vm5, %v241_v29 }
 0x14b   :  { %v263_v30 = vpop.permute.xlu0 %262  ;;  %v265_v31 = vpop.permute.xlu1 %264 }
 0x14c   :  { %296 = vst.msk [vmem:[%s774_s4 + $0x70] sm:$0xff] %vm217_vm5, %v263_v30 }
 0x14d   :  { %297 = vst.msk [vmem:[%s774_s4 + $0x78] sm:$0xff] %vm217_vm5, %v265_v31 }

// kernel: sparse_gat_forward.3
= control target key start
LH: loop header
LB: loop body
LE: loop exit
PB: predicated region body
PF: predicated region fallthrough
CT: control target
= control target key end

     0   :  { %v418_v0 = vmov 0   ;;  %s532_s2 = inlined_call_operand.vmem [shape: f32[32,1], index: 2, kind: input, shape index: {}]   ;;  %s533_s3 = inlined_call_operand.vmem [shape: f32[32,1], index: 3, kind: input, shape index: {}]   ;;  %s534_s4 = inlined_call_operand.vmem [shape: f32[1,128], index: 4, kind: input, shape index: {}]   ;;  %s535_s1 = inlined_call_operand.vmem [shape: bf16[128,128], index: 1, kind: input, shape index: {}]   ;;  %s536_s0 = inlined_call_operand.vmem [shape: s8[32,128], index: 0, kind: input, shape index: {}]   ;;  %s537_s5 = inlined_call_operand.vmem [shape: f32[1,128], index: 5, kind: input, shape index: {}]   ;;  %s538_s6 = inlined_call_operand.vmem [shape: f32[32,128], index: 6, kind: output, shape index: {}]  }
   0x1   :  { %395 = vset.pattern.permute.xlu1 %v418_v0  ;;  %394 = vset.pattern.permute.xlu0 %v418_v0  ;;  %v33_v1 = vld [vmem:[%s532_s2 + $0x10] sm:$0xff]  ;;  %v31_v2 = vld [vmem:[%s532_s2] sm:$0xff]  ;;  %v34_v4 = vld [vmem:[%s532_s2 + $0x18] sm:$0xff] }
   0x2   :  { %48 = vperm.xlu1 %395, %v33_v1   ;;  %38 = vperm.xlu0 %394, %v31_v2   ;;  %v71_v3 = vld [vmem:[%s533_s3] sm:$0xff]  ;;  %v32_v5 = vld [vmem:[%s532_s2 + $0x8] sm:$0xff]  ;;  %v74_v7 = vld [vmem:[%s533_s3 + $0x18] sm:$0xff]  ;;  %v419_v1 = vmov 125  }
   0x3   :  { %396 = vset.pattern.permute.xlu2 %v418_v0  ;;  %v72_v6 = vld [vmem:[%s533_s3 + $0x8] sm:$0xff]  ;;  %v73_v8 = vld [vmem:[%s533_s3 + $0x10] sm:$0xff]  ;;  %v373_v9 = vld [vmem:[%s535_s1 + $0x38] sm:$0xff] }
   0x4   :  { %77 = vperm.xlu2 %396, %v71_v3   ;;  %198 = vmatpush.bf16.msra.mxu0 %v373_v9  ;;  %v372_v10 = vld [vmem:[%s535_s1 + $0x30] sm:$0xff]  ;;  %v371_v11 = vld [vmem:[%s535_s1 + $0x28] sm:$0xff]  ;;  %v370_v12 = vld [vmem:[%s535_s1 + $0x20] sm:$0xff] }
   0x5   :  { %382 = vmatpush.bf16.msra.mxu1 %v373_v9  ;;  %v369_v13 = vld [vmem:[%s535_s1 + $0x18] sm:$0xff]  ;;  %v368_v14 = vld [vmem:[%s535_s1 + $0x10] sm:$0xff]  ;;  %v367_v15 = vld [vmem:[%s535_s1 + $0x8] sm:$0xff] }
   0x6   :  { %v366_v16 = vld [vmem:[%s535_s1] sm:$0xff] }
   0x7   :  { %v400_v17 = vld [vmem:[%s534_s4] ss:$0 sm:$0xff] }
   0x8   :  { %199 = vmatpush.bf16.msra.mxu0 %v372_v10  ;;  %v375_v39 = vld [vmem:[%s536_s0] sm:$0xff]  }
   0x9   :  { %383 = vmatpush.bf16.msra.mxu1 %v372_v10  ;;  %v376_v45 = vunpack.c.0.s8 %v375_v39  ;;  %v377_v46 = vunpack.c.1.s8 %v375_v39  ;;  %v381_v49 = vunpack.c.3.s8 %v375_v39  ;;  %v380_v50 = vunpack.c.2.s8 %v375_v39 }
   0xa   :  { %53 = vperm.xlu1 %395, %v34_v4   ;;  %43 = vperm.xlu0 %394, %v32_v5  }
   0xb   :  { %v115_v51 = vcvt.s32.f32 %v376_v45  ;;  %v116_v52 = vcvt.s32.f32 %v377_v46  ;;  %v118_v54 = vcvt.s32.f32 %v381_v49  ;;  %v117_v56 = vcvt.s32.f32 %v380_v50 }
   0xc   :  { %82 = vperm.xlu2 %396, %v72_v6   ;;  %200 = vmatpush.bf16.msra.mxu0 %v371_v11 }
   0xd   :  { %384 = vmatpush.bf16.msra.mxu1 %v371_v11 }
  0x10   :  { %201 = vmatpush.bf16.msra.mxu0 %v370_v12 }
  0x11   :  { %385 = vmatpush.bf16.msra.mxu1 %v370_v12 }
  0x12   :  { %92 = vperm.xlu1 %395, %v74_v7   ;;  %87 = vperm.xlu0 %394, %v73_v8  }
  0x14   :  { %202 = vmatpush.bf16.msra.mxu0 %v369_v13  ;;  %397 = vset.pattern.permute.xlu2 %v419_v1 }
  0x15   :  { %386 = vmatpush.bf16.msra.mxu1 %v369_v13 }
  0x18   :  { %203 = vmatpush.bf16.msra.mxu0 %v368_v14 }
  0x19   :  { %387 = vmatpush.bf16.msra.mxu1 %v368_v14 }
  0x1a   :  { %399 = vset.pattern.permute.xlu1 %v419_v1  ;;  %398 = vset.pattern.permute.xlu0 %v419_v1 }
  0x1c   :  { %204 = vmatpush.bf16.msra.mxu0 %v367_v15 }
  0x1d   :  { %388 = vmatpush.bf16.msra.mxu1 %v367_v15 }
  0x20   :  { %205 = vmatpush.bf16.msra.mxu0 %v366_v16 }
  0x21   :  { %389 = vmatpush.bf16.msra.mxu1 %v366_v16 }
  0x5e   :  { %v78_v22 = vpop.permute.xlu2 %77 }
  0x66   :  { %v83_v35 = vpop.permute.xlu2 %82 }
  0x74   :  { %v49_v18 = vpop.permute.xlu1 %48  ;;  %v39_v19 = vpop.permute.xlu0 %38 }
  0x75   :  { %v59_v20 = vadd.f32 %v400_v17, %v39_v19  ;;  %v61_v24 = vadd.f32 %v400_v17, %v49_v18 }
  0x77   :  { %v63_v21 = vmul.f32 0.2, %v59_v20  ;;  %v65_v30 = vmul.f32 0.2, %v61_v24 }
  0x79   :  { %v67_v23 = vmax.f32 %v59_v20, %v63_v21  ;;  %v69_v38 = vmax.f32 %v61_v24, %v65_v30  ;;  %v401_v20 = vld [vmem:[%s537_s5] ss:$0 sm:$0xff] }
  0x7b   :  { %v95_v27 = vsub.f32 %v67_v23, %v78_v22 }
  0x7c   :  { %v54_v25 = vpop.permute.xlu1 %53  ;;  %v44_v26 = vpop.permute.xlu0 %43 }
  0x7d   :  { %v62_v28 = vadd.f32 %v400_v17, %v54_v25  ;;  %v60_v29 = vadd.f32 %v400_v17, %v44_v26  ;;  %v99_v33 = vmul.f32 1.442695, %v95_v27 }
  0x7f   :  { %v66_v31 = vmul.f32 0.2, %v62_v28  ;;  %v64_v32 = vmul.f32 0.2, %v60_v29  ;;  %402 = vpow2.f32 %v99_v33 }
  0x81   :  { %v68_v34 = vmax.f32 %v60_v29, %v64_v32  ;;  %v70_v37 = vmax.f32 %v62_v28, %v66_v31 }
  0x83   :  { %v96_v36 = vsub.f32 %v68_v34, %v83_v35 }
  0x84   :  { %v93_v40 = vpop.permute.xlu1 %92  ;;  %v88_v41 = vpop.permute.xlu0 %87 }
  0x85   :  { %v101_v42 = vmul.f32 1.442695, %v96_v36  ;;  %v98_v43 = vsub.f32 %v70_v37, %v93_v40  ;;  %v97_v44 = vsub.f32 %v69_v38, %v88_v41  ;;  %v403_v53 = vpop.eup %402 }
  0x86   :  { %v119_v57 = vmul.f32 %v403_v53, %v115_v51 }
  0x87   :  { %404 = vpow2.f32 %v101_v42  ;;  %v105_v47 = vmul.f32 1.442695, %v98_v43  ;;  %v103_v48 = vmul.f32 1.442695, %v97_v44 }
  0x89   :  { %406 = vpow2.f32 %v105_v47 }
  0x8a   :  { %408 = vpow2.f32 %v103_v48 }
  0x8d   :  { %v405_v55 = vpop.eup %404 }
  0x8e   :  { %v120_v58 = vmul.f32 %v405_v55, %v116_v52 }
  0x8f   :  { %v407_v59 = vpop.eup %406 }
  0x90   :  { %v409_v60 = vpop.eup %408  ;;  %v123_v61 = vpack.c.bf16 %v120_v58, %v119_v57  ;;  %v122_v62 = vmul.f32 %v407_v59, %v118_v54 }
  0x91   :  { %v121_v63 = vmul.f32 %v409_v60, %v117_v56 }
  0x92   :  { %206 = vmatmul.bf16.vlgmr.msra.gmra.mxu0 %v123_v61 }
  0x93   :  { %v124_v0 = vpack.c.bf16 %v122_v62, %v121_v63 }
  0x95   :  { %211 = vmatmul.bf16.vlgmr.msra.gmra.mxu1 %v124_v0 }
 0x10f   :  { %v207_v2 = vpop.f32.mrf.mxu0 }
 0x110   :  { %v232_v4 = vmax.f32 %v207_v2, 1e-30 }
 0x112   :  { %v509_v3 = vpop.f32.mrf.mxu1  ;;  %238 = vperm.xlu2 %397, %v232_v4  }
 0x113   :  { %v234_v5 = vmax.f32 %v509_v3, 1e-30 }
 0x115   :  { %248 = vperm.xlu1 %399, %v234_v5  }
 0x117   :  { %v512_v6 = vpop.f32.mrf.mxu0 }
 0x118   :  { %v233_v8 = vmax.f32 %v512_v6, 1e-30 }
 0x11a   :  { %v214_v7 = vpop.f32.mrf.mxu1  ;;  %243 = vperm.xlu0 %398, %v233_v8  }
 0x11b   :  { %v235_v9 = vmax.f32 %v214_v7, 1e-30 }
 0x11d   :  { %253 = vperm.xlu2 %397, %v235_v9  }
 0x16c   :  { %v239_v10 = vpop.permute.xlu2 %238 }
 0x16d   :  { %410 = vrcp.f32 %v239_v10  ;;  %v267_v14 = vand.u32 2147483648, %v239_v10  ;;  %v265_v17 = vand.u32 2147483647, %v239_v10  ;;  %vm261_vm1 = vweird.f32 %v239_v10 }
 0x16f   :  { %v268_v19 = vor.u32 1.1754944e-38, %v267_v14  ;;  %vm266_vm3 = vcmp.eq.f32.partialorder %v265_v17, 8.507059e+37 }
 0x173   :  { %v411_v11 = vpop.eup %410 }
 0x174   :  { %v257_v12 = vmul.f32 %v411_v11, %v239_v10  ;;  %vm262_vm0 = vweird.f32 %v411_v11 }
 0x175   :  { %vm263_vm2 = vmor %vm261_vm1, %vm262_vm0 }
 0x176   :  { %v258_v13 = vsub.f32 1.0, %v257_v12 }
 0x177   :  { %v254_v15 = vpop.permute.xlu2 %253 }
 0x178   :  { %v259_v16 = vmul.f32 %v411_v11, %v258_v13  ;;  %412 = vrcp.f32 %v254_v15  ;;  %v312_v28 = vand.u32 2147483648, %v254_v15  ;;  %v310_v30 = vand.u32 2147483647, %v254_v15 }
 0x179   :  { %vm306_vm5 = vweird.f32 %v254_v15 }
 0x17a   :  { %v260_v18 = vadd.f32 %v411_v11, %v259_v16  ;;  %v313_v32 = vor.u32 1.1754944e-38, %v312_v28  ;;  %vm311_vm7 = vcmp.eq.f32.partialorder %v310_v30, 8.507059e+37 }
 0x17c   :  { %v264_v21 = vsel %vm263_vm2, %v411_v11, %v260_v18 }
 0x17d   :  { %v269_v22 = vsel %vm266_vm3, %v268_v19, %v264_v21 }
 0x17e   :  { %v413_v23 = vpop.eup %412  ;;  %v270_v24 = vmul.f32 %v269_v22, %v207_v2 }
 0x17f   :  { %v302_v25 = vmul.f32 %v413_v23, %v254_v15  ;;  %vm307_vm4 = vweird.f32 %v413_v23 }
 0x180   :  { %v320_v26 = vadd.f32 %v401_v20, %v270_v24  ;;  %vm308_vm6 = vmor %vm306_vm5, %vm307_vm4 }
 0x181   :  { %v303_v27 = vsub.f32 1.0, %v302_v25 }
 0x182   :  { %324 = vst [vmem:[%s538_s6] sm:$0xff] %v320_v26 }
 0x183   :  { %v304_v29 = vmul.f32 %v413_v23, %v303_v27 }
 0x185   :  { %v305_v31 = vadd.f32 %v413_v23, %v304_v29 }
 0x187   :  { %v309_v33 = vsel %vm308_vm6, %v413_v23, %v305_v31  ;;  %v249_v34 = vpop.permute.xlu1 %248 }
 0x188   :  { %v314_v35 = vsel %vm311_vm7, %v313_v32, %v309_v33  ;;  %414 = vrcp.f32 %v249_v34  ;;  %v297_v42 = vand.u32 2147483648, %v249_v34  ;;  %v295_v45 = vand.u32 2147483647, %v249_v34 }
 0x189   :  { %v315_v36 = vmul.f32 %v314_v35, %v214_v7  ;;  %vm291_vm9 = vweird.f32 %v249_v34 }
 0x18a   :  { %v298_v48 = vor.u32 1.1754944e-38, %v297_v42  ;;  %vm296_vm11 = vcmp.eq.f32.partialorder %v295_v45, 8.507059e+37 }
 0x18b   :  { %v323_v37 = vadd.f32 %v401_v20, %v315_v36 }
 0x18c   :  { %v244_v38 = vpop.permute.xlu0 %243 }
 0x18d   :  { %327 = vst [vmem:[%s538_s6 + $0x18] sm:$0xff] %v323_v37  ;;  %416 = vrcp.f32 %v244_v38  ;;  %v282_v51 = vand.u32 2147483648, %v244_v38  ;;  %v280_v54 = vand.u32 2147483647, %v244_v38  ;;  %vm276_vm13 = vweird.f32 %v244_v38 }
 0x18e   :  { %v415_v39 = vpop.eup %414 }
 0x18f   :  { %v287_v40 = vmul.f32 %v415_v39, %v249_v34  ;;  %vm292_vm8 = vweird.f32 %v415_v39  ;;  %v283_v58 = vor.u32 1.1754944e-38, %v282_v51  ;;  %vm281_vm15 = vcmp.eq.f32.partialorder %v280_v54, 8.507059e+37 }
 0x190   :  { %vm293_vm10 = vmor %vm291_vm9, %vm292_vm8 }
 0x191   :  { %v288_v41 = vsub.f32 1.0, %v287_v40 }
 0x193   :  { %v417_v43 = vpop.eup %416  ;;  %v289_v44 = vmul.f32 %v415_v39, %v288_v41 }
 0x194   :  { %v272_v46 = vmul.f32 %v417_v43, %v244_v38  ;;  %vm277_vm12 = vweird.f32 %v417_v43 }
 0x195   :  { %v290_v47 = vadd.f32 %v415_v39, %v289_v44  ;;  %vm278_vm14 = vmor %vm276_vm13, %vm277_vm12 }
 0x196   :  { %v273_v49 = vsub.f32 1.0, %v272_v46 }
 0x197   :  { %v294_v50 = vsel %vm293_vm10, %v415_v39, %v290_v47 }
 0x198   :  { %v299_v52 = vsel %vm296_vm11, %v298_v48, %v294_v50  ;;  %v274_v53 = vmul.f32 %v417_v43, %v273_v49 }
 0x199   :  { %v300_v55 = vmul.f32 %v299_v52, %v509_v3 }
 0x19a   :  { %v275_v56 = vadd.f32 %v417_v43, %v274_v53 }
 0x19b   :  { %v322_v57 = vadd.f32 %v401_v20, %v300_v55 }
 0x19c   :  { %v279_v59 = vsel %vm278_vm14, %v417_v43, %v275_v56 }
 0x19d   :  { %326 = vst [vmem:[%s538_s6 + $0x10] sm:$0xff] %v322_v57  ;;  %v284_v60 = vsel %vm281_vm15, %v283_v58, %v279_v59 }
 0x19e   :  { %v285_v61 = vmul.f32 %v284_v60, %v512_v6 }
 0x1a0   :  { %v321_v62 = vadd.f32 %v401_v20, %v285_v61 }
 0x1a2   :  { %325 = vst [vmem:[%s538_s6 + $0x8] sm:$0xff] %v321_v62 }

</bundles_post_ra>
